<compile_context>
chip_gen: v6e
topology: v6e:2x2x1
jax: 0.10.0
libtpu: 0.0.40
codegen_flags: <defaults>
</compile_context>

<pallas_src>
import jax
import jax.numpy as jnp
from jax.experimental import pallas as pl
from jax.experimental.pallas import tpu as pltpu

IN_FEATS = 16
OUT_FEATS = 7

_MAX_TILE_N = 8192  # ~0.5 MiB f32 x-tile; x2 double-buffered << 32 MiB VMEM budget


def _round_up(x, m):
    return ((x + m - 1) // m) * m


def _choose_tile(n, align, target=_MAX_TILE_N):
    """Largest `align`-aligned tile <= target; small n collapses to one block."""
    if n <= target:
        return _round_up(max(n, 1), align)
    return target  # target is a multiple of both 8 and 128


def _matmul_kernel(a_ref, b_ref, o_ref):
    # Single-tile MXU matmul with f32 accumulation.
    o_ref[...] = jnp.dot(
        a_ref[...], b_ref[...], preferred_element_type=jnp.float32
    ).astype(o_ref.dtype)


def _cost(n, itemsize):
    flops = 2 * n * IN_FEATS * OUT_FEATS
    bytes_accessed = (n * (IN_FEATS + OUT_FEATS) + IN_FEATS * OUT_FEATS) * itemsize
    return pl.CostEstimate(flops=flops, transcendentals=0, bytes_accessed=bytes_accessed)


def net2_forward(x, w, *, tile_n=None):
    """Row-major path matching the torch layout.

    x: [N, IN_FEATS] node features, w: [IN_FEATS, OUT_FEATS] (= W_torch.T).
    Returns [N, OUT_FEATS].
    """
    n, in_feats = x.shape
    assert in_feats == IN_FEATS and w.shape == (IN_FEATS, OUT_FEATS)
    if tile_n is None:
        tile_n = _choose_tile(n, align=8)
    assert tile_n % 8 == 0
    grid_n = pl.cdiv(n, tile_n)

    return pl.pallas_call(
        _matmul_kernel,
        out_shape=jax.ShapeDtypeStruct((n, OUT_FEATS), x.dtype),
        grid_spec=pltpu.PrefetchScalarGridSpec(
            num_scalar_prefetch=0,
            grid=(grid_n,),
            in_specs=[
                # x tile streams per grid step (double-buffered by Pallas).
                pl.BlockSpec((tile_n, IN_FEATS), lambda i: (i, 0)),
                # Weight: constant block index -> DMA hoisted, resident in VMEM.
                pl.BlockSpec((IN_FEATS, OUT_FEATS), lambda i: (0, 0)),
            ],
            out_specs=pl.BlockSpec((tile_n, OUT_FEATS), lambda i: (i, 0)),
        ),
        compiler_params=pltpu.CompilerParams(
            dimension_semantics=("parallel",),  # megacore sharding on v7x
        ),
        cost_estimate=_cost(n, jnp.dtype(x.dtype).itemsize),
    )(x, w)


def net2_forward_lane_dense(x_t, w_torch, *, tile_n=None):
    """Lane-dense path: node axis on the 128-lane axis for both input and output.

    x_t: [IN_FEATS, N] (transposed node features), w_torch: [OUT_FEATS, IN_FEATS]
    (torch weight layout).  Returns [OUT_FEATS, N] == (x @ W_torch.T).T.
    Use this when the caller can produce/consume features with nodes last.
    """
    in_feats, n = x_t.shape
    assert in_feats == IN_FEATS and w_torch.shape == (OUT_FEATS, IN_FEATS)
    if tile_n is None:
        tile_n = _choose_tile(n, align=128)
    assert tile_n % 128 == 0 or tile_n == n
    grid_n = pl.cdiv(n, tile_n)

    return pl.pallas_call(
        _matmul_kernel,
        out_shape=jax.ShapeDtypeStruct((OUT_FEATS, n), x_t.dtype),
        grid_spec=pltpu.PrefetchScalarGridSpec(
            num_scalar_prefetch=0,
            grid=(grid_n,),
            in_specs=[
                # Weight first (LHS of the dot); constant block -> resident.
                pl.BlockSpec((OUT_FEATS, IN_FEATS), lambda i: (0, 0)),
                # x_t tile: full 128-lane loads along the node axis.
                pl.BlockSpec((IN_FEATS, tile_n), lambda i: (0, i)),
            ],
            out_specs=pl.BlockSpec((OUT_FEATS, tile_n), lambda i: (0, i)),
        ),
        compiler_params=pltpu.CompilerParams(
            dimension_semantics=("parallel",),
        ),
        cost_estimate=_cost(n, jnp.dtype(x_t.dtype).itemsize),
    )(w_torch, x_t)


def init_params(key):
    # Deterministic init mimicking nn.Linear default (uniform in +-1/sqrt(fan_in)).
    bound = 1.0 / jnp.sqrt(jnp.float32(IN_FEATS))
    w_torch = jax.random.uniform(
        key, (OUT_FEATS, IN_FEATS), minval=-bound, maxval=bound, dtype=jnp.float32
    )
    # Stored transposed so the row-major kernel computes x @ W directly.
    return w_torch.T  # [IN_FEATS, OUT_FEATS]


def reference_forward(x, w):
    # Pure-JAX reference of the torch semantics: F.linear(x, W_torch) == x @ W_torch.T.
    return x @ w


if __name__ == "__main__":
    key = jax.random.PRNGKey(0)
    k_w, k_x = jax.random.split(key)

    # Small synthetic graph; the graph structure is unused by Net2's forward.
    num_nodes = 2048
    x = jax.random.normal(k_x, (num_nodes, IN_FEATS), dtype=jnp.float32)
    w = init_params(k_w)  # [IN_FEATS, OUT_FEATS]

    ref = reference_forward(x, w)

    # Row-major path ([N,16] -> [N,7]); tile_n=512 exercises a 4-step pipeline.
    out = jax.block_until_ready(net2_forward(x, w, tile_n=512))
    assert out.shape == (num_nodes, OUT_FEATS)
    assert jnp.allclose(out, ref, atol=1e-5, rtol=1e-5)

    # Lane-dense path ([16,N] -> [7,N]) for callers that keep the node axis last.
    # (Transpose here is only for the demo/validation; a real caller would
    #  produce x in [16, N] layout directly to keep the bandwidth win.)
    out_t = jax.block_until_ready(net2_forward_lane_dense(x.T, w.T, tile_n=512))
    assert out_t.shape == (OUT_FEATS, num_nodes)
    assert jnp.allclose(out_t.T, ref, atol=1e-5, rtol=1e-5)

    print("KERNEL_OK")
</pallas_src>

<mosaic_0001>
module attributes {stable_mosaic.version = 11 : i64} {
  func.func @_matmul_kernel(%arg0: i32, %arg1: memref<512x16xf32, #tpu.memory_space<vmem>>, %arg2: memref<16x7xf32, #tpu.memory_space<vmem>>, %arg3: memref<512x7xf32, #tpu.memory_space<vmem>>) attributes {dimension_semantics = [#tpu.dimension_semantics<parallel>], iteration_bounds = array<i64: 4>, scalar_prefetch = 0 : i64, scratch_operands = 0 : i64, tpu.core_type = #tpu.core_type<tc>, window_params = [{transform_indices = @transform_0, window_bounds = array<i64: 512, 16>}, {pipeline_mode = #tpu.pipeline_mode<synchronous>, transform_indices = @transform_1, window_bounds = array<i64: 16, 7>}, {transform_indices = @transform_2, window_bounds = array<i64: 512, 7>}]} {
    %c0 = arith.constant 0 : index
    %c0_0 = arith.constant 0 : index
    %0 = vector.load %arg1[%c0, %c0_0] : memref<512x16xf32, #tpu.memory_space<vmem>>, vector<512x16xf32>
    %c0_1 = arith.constant 0 : index
    %c0_2 = arith.constant 0 : index
    %1 = vector.load %arg2[%c0_1, %c0_2] : memref<16x7xf32, #tpu.memory_space<vmem>>, vector<16x7xf32>
    %cst = arith.constant dense<0.000000e+00> : vector<512x7xf32>
    %2 = tpu.matmul %0, %1, %cst {dimension_numbers = #tpu.dot_dimension_numbers<[1], [0], [0], [1], [0, 0, 1, 1], [], []>} : vector<512x16xf32>, vector<16x7xf32>, vector<512x7xf32> -> vector<512x7xf32>
    %c0_3 = arith.constant 0 : index
    %c0_4 = arith.constant 0 : index
    %3 = vector.load %arg3[%c0_3, %c0_4] : memref<512x7xf32, #tpu.memory_space<vmem>>, vector<512x7xf32>
    tpu.vector_store %arg3[%c0_3, %c0_4], %2 {strides = array<i32>} : memref<512x7xf32, #tpu.memory_space<vmem>>, vector<512x7xf32>,
    return
  }
  func.func @transform_0(%arg0: i32) -> (i32, i32) {
    %c0_i32 = arith.constant 0 : i32
    %c0_i32_0 = arith.constant 0 : i32
    return %arg0, %c0_i32 : i32, i32
  }
  func.func @transform_1(%arg0: i32) -> (i32, i32) {
    %c0_i32 = arith.constant 0 : i32
    %c0_i32_0 = arith.constant 0 : i32
    %c0_i32_1 = arith.constant 0 : i32
    return %c0_i32, %c0_i32_0 : i32, i32
  }
  func.func @transform_2(%arg0: i32) -> (i32, i32) {
    %c0_i32 = arith.constant 0 : i32
    %c0_i32_0 = arith.constant 0 : i32
    return %arg0, %c0_i32 : i32, i32
  }
}

</mosaic_0001>

<bundles_post_ra>
// kernel: tpu_custom_call.1
= control target key start
LH: loop header
LB: loop body
LE: loop exit
PB: predicated region body
PF: predicated region fallthrough
CT: control target
= control target key end

     0   :  { %s1188_s9 = smov 0   ;;  %s1478_s0 = inlined_call_operand.vmem [shape: f32[2048,16], index: 0, kind: input, shape index: {}]   ;;  %s1479_s1 = inlined_call_operand.vmem [shape: f32[16,7], index: 1, kind: input, shape index: {}]   ;;  %s1480_s2 = inlined_call_operand.vmem [shape: f32[2048,7], index: 2, kind: output, shape index: {}]  }
   0x1 LB: > { %s912_s10 = sadd.s32 4294967295, %s1171_s9   ;;  %p916_p0 = scmp.ge.s32.totalorder %s1171_s9, 1  ;;  %s1171_s9 = sphi %s1188_s9, %s12_s9  }
   0x2   : > { %p113_p1 = scmp.lt.s32.totalorder %s1171_s9, 5 }
   0x4   : > { %p114_p2 = pnand %p916_p0, %p113_p1 }
   0x5   : > { %s917_s15 = sshll.u32 (!%p114_p2), %s912_s10, 6 }
   0x6   : > { %117 = sbr.rel (%p114_p2) target bundleno = 273 (0x111), region = 28  ;;  %p136_p3 = scmp.lt.s32.totalorder (!%p114_p2), %s917_s15, 255 }
   0xb   : > { %v212_v0 = vld [vmem:[%s1479_s1 + $0x8] sm:$0xff]  ;;  %v211_v1 = vld [vmem:[%s1479_s1] sm:$0xff]  ;;  %s1482_s15 = smov (!%p136_p3, %s917_s15), 255  ;;  %vm213_vm0 = vcmask 130048   ;;  %vm791_vm1 = vcmask 56320  }
   0xc   : > { %1053 = vmatprep.subr.mxu0 %v212_v0  ;;  %1153 = vmatprep.subr.mxu1 %v212_v0  ;;  %s918_s16 = sshll.u32 %s1482_s15, 3 }
   0xd   : > { %1054 = vmatpush3.msra.mxu0 %v212_v0  ;;  %1155 = vmatpush3.msra.mxu1 %v212_v0  ;;  %s1210_s19 = scalar_lea.vmem %s1478_s0, %s918_s16  ;;  %s1345_s22 = scalar_lea.vmem %s1480_s2, %s918_s16 }
   0xe   : > { %1055 = vmatprep.subr.mxu0 %v211_v1  ;;  %1154 = vmatprep.subr.mxu1 %v211_v1  ;;  %v147_v2 = vld [vmem:[%s1210_s19] sm:$0xff]  ;;  %v148_v4 = vld [vmem:[%s1210_s19 + $0x8] sm:$0xff]  ;;  %v149_v6 = vld [vmem:[%s1210_s19 + $0x10] sm:$0xff] }
   0xf   : > { %1056 = vmatpush3.msra.mxu0 %v211_v1  ;;  %1156 = vmatpush3.msra.mxu1 %v211_v1  ;;  %v179_v3 = vld [vmem:[%s1210_s19 + $0x100] sm:$0xff]  ;;  %v180_v5 = vld [vmem:[%s1210_s19 + $0x108] sm:$0xff]  ;;  %v181_v7 = vld [vmem:[%s1210_s19 + $0x110] sm:$0xff] }
  0x10   : > { %1057 = vmatprep.mubr.msk.f32.mxu0 %vm213_vm0, %v147_v2  ;;  %1105 = vmatprep.mubr.msk.f32.mxu1 %vm213_vm0, %v179_v3  ;;  %v150_v8 = vld [vmem:[%s1210_s19 + $0x18] sm:$0xff]  ;;  %v151_v10 = vld [vmem:[%s1210_s19 + $0x20] sm:$0xff]  ;;  %v152_v12 = vld [vmem:[%s1210_s19 + $0x28] sm:$0xff] }
  0x11   : > { %1058 = vmatmul.mubr.msk.f32.vlgmr.msra.gmra.mxu0 %vm213_vm0, %v148_v4  ;;  %1106 = vmatmul.mubr.msk.f32.vlgmr.msra.gmra.mxu1 %vm213_vm0, %v180_v5  ;;  %v182_v9 = vld [vmem:[%s1210_s19 + $0x118] sm:$0xff]  ;;  %v183_v11 = vld [vmem:[%s1210_s19 + $0x120] sm:$0xff]  ;;  %v184_v13 = vld [vmem:[%s1210_s19 + $0x128] sm:$0xff] }
  0x12   : > { %1060 = vmatprep.mubr.msk.f32.mxu0 %vm213_vm0, %v149_v6  ;;  %1108 = vmatprep.mubr.msk.f32.mxu1 %vm213_vm0, %v181_v7  ;;  %v153_v14 = vld [vmem:[%s1210_s19 + $0x30] sm:$0xff]  ;;  %v154_v16 = vld [vmem:[%s1210_s19 + $0x38] sm:$0xff]  ;;  %v155_v18 = vld [vmem:[%s1210_s19 + $0x40] sm:$0xff] }
  0x13   : > { %v185_v15 = vld [vmem:[%s1210_s19 + $0x130] sm:$0xff]  ;;  %v186_v17 = vld [vmem:[%s1210_s19 + $0x138] sm:$0xff]  ;;  %v187_v19 = vld [vmem:[%s1210_s19 + $0x140] sm:$0xff] }
  0x14   : > { %v156_v20 = vld [vmem:[%s1210_s19 + $0x48] sm:$0xff]  ;;  %v157_v22 = vld [vmem:[%s1210_s19 + $0x50] sm:$0xff]  ;;  %v158_v24 = vld [vmem:[%s1210_s19 + $0x58] sm:$0xff] }
  0x15   : > { %1061 = vmatmul.mubr.msk.f32.gmra.mxu0 %vm213_vm0, %v150_v8  ;;  %1109 = vmatmul.mubr.msk.f32.gmra.mxu1 %vm213_vm0, %v182_v9  ;;  %v188_v21 = vld [vmem:[%s1210_s19 + $0x148] sm:$0xff]  ;;  %v189_v23 = vld [vmem:[%s1210_s19 + $0x150] sm:$0xff]  ;;  %v190_v25 = vld [vmem:[%s1210_s19 + $0x158] sm:$0xff] }
  0x16   : > { %1063 = vmatprep.mubr.msk.f32.mxu0 %vm213_vm0, %v151_v10  ;;  %1111 = vmatprep.mubr.msk.f32.mxu1 %vm213_vm0, %v183_v11  ;;  %v159_v26 = vld [vmem:[%s1210_s19 + $0x60] sm:$0xff]  ;;  %v160_v28 = vld [vmem:[%s1210_s19 + $0x68] sm:$0xff]  ;;  %v161_v30 = vld [vmem:[%s1210_s19 + $0x70] sm:$0xff] }
  0x17   : > { %v191_v27 = vld [vmem:[%s1210_s19 + $0x160] sm:$0xff]  ;;  %v192_v29 = vld [vmem:[%s1210_s19 + $0x168] sm:$0xff]  ;;  %v193_v31 = vld [vmem:[%s1210_s19 + $0x170] sm:$0xff] }
  0x18   : > { %v162_v32 = vld [vmem:[%s1210_s19 + $0x78] sm:$0xff]  ;;  %v163_v34 = vld [vmem:[%s1210_s19 + $0x80] sm:$0xff]  ;;  %v164_v36 = vld [vmem:[%s1210_s19 + $0x88] sm:$0xff] }
  0x19   : > { %1064 = vmatmul.mubr.msk.f32.gmra.mxu0 %vm213_vm0, %v152_v12  ;;  %1112 = vmatmul.mubr.msk.f32.gmra.mxu1 %vm213_vm0, %v184_v13  ;;  %v194_v33 = vld [vmem:[%s1210_s19 + $0x178] sm:$0xff]  ;;  %v195_v35 = vld [vmem:[%s1210_s19 + $0x180] sm:$0xff]  ;;  %v196_v37 = vld [vmem:[%s1210_s19 + $0x188] sm:$0xff] }
  0x1a   : > { %1066 = vmatprep.mubr.msk.f32.mxu0 %vm213_vm0, %v153_v14  ;;  %1114 = vmatprep.mubr.msk.f32.mxu1 %vm213_vm0, %v185_v15  ;;  %v165_v38 = vld [vmem:[%s1210_s19 + $0x90] sm:$0xff]  ;;  %v166_v40 = vld [vmem:[%s1210_s19 + $0x98] sm:$0xff]  ;;  %v167_v42 = vld [vmem:[%s1210_s19 + $0xa0] sm:$0xff] }
  0x1b   : > { %v197_v39 = vld [vmem:[%s1210_s19 + $0x190] sm:$0xff]  ;;  %v198_v41 = vld [vmem:[%s1210_s19 + $0x198] sm:$0xff]  ;;  %v199_v43 = vld [vmem:[%s1210_s19 + $0x1a0] sm:$0xff] }
  0x1c   : > { %v168_v44 = vld [vmem:[%s1210_s19 + $0xa8] sm:$0xff]  ;;  %v169_v46 = vld [vmem:[%s1210_s19 + $0xb0] sm:$0xff]  ;;  %v170_v48 = vld [vmem:[%s1210_s19 + $0xb8] sm:$0xff] }
  0x1d   : > { %1067 = vmatmul.mubr.msk.f32.gmra.mxu0 %vm213_vm0, %v154_v16  ;;  %1115 = vmatmul.mubr.msk.f32.gmra.mxu1 %vm213_vm0, %v186_v17  ;;  %v200_v45 = vld [vmem:[%s1210_s19 + $0x1a8] sm:$0xff]  ;;  %v201_v47 = vld [vmem:[%s1210_s19 + $0x1b0] sm:$0xff]  ;;  %v202_v49 = vld [vmem:[%s1210_s19 + $0x1b8] sm:$0xff] }
  0x1e   : > { %1069 = vmatprep.mubr.msk.f32.mxu0 %vm213_vm0, %v155_v18  ;;  %1117 = vmatprep.mubr.msk.f32.mxu1 %vm213_vm0, %v187_v19  ;;  %v171_v50 = vld [vmem:[%s1210_s19 + $0xc0] sm:$0xff]  ;;  %v172_v52 = vld [vmem:[%s1210_s19 + $0xc8] sm:$0xff]  ;;  %v173_v54 = vld [vmem:[%s1210_s19 + $0xd0] sm:$0xff] }
  0x1f   : > { %v203_v51 = vld [vmem:[%s1210_s19 + $0x1c0] sm:$0xff]  ;;  %v204_v53 = vld [vmem:[%s1210_s19 + $0x1c8] sm:$0xff]  ;;  %v205_v55 = vld [vmem:[%s1210_s19 + $0x1d0] sm:$0xff] }
  0x20   : > { %v174_v56 = vld [vmem:[%s1210_s19 + $0xd8] sm:$0xff]  ;;  %v175_v58 = vld [vmem:[%s1210_s19 + $0xe0] sm:$0xff]  ;;  %v176_v60 = vld [vmem:[%s1210_s19 + $0xe8] sm:$0xff] }
  0x21   : > { %1070 = vmatmul.mubr.msk.f32.gmra.mxu0 %vm213_vm0, %v156_v20  ;;  %1118 = vmatmul.mubr.msk.f32.gmra.mxu1 %vm213_vm0, %v188_v21  ;;  %v206_v57 = vld [vmem:[%s1210_s19 + $0x1d8] sm:$0xff]  ;;  %v207_v59 = vld [vmem:[%s1210_s19 + $0x1e0] sm:$0xff]  ;;  %v208_v61 = vld [vmem:[%s1210_s19 + $0x1e8] sm:$0xff] }
  0x22   : > { %1072 = vmatprep.mubr.msk.f32.mxu0 %vm213_vm0, %v157_v22  ;;  %1120 = vmatprep.mubr.msk.f32.mxu1 %vm213_vm0, %v189_v23  ;;  %v177_v62 = vld [vmem:[%s1210_s19 + $0xf0] sm:$0xff]  ;;  %v178_v0 = vld [vmem:[%s1210_s19 + $0xf8] sm:$0xff] }
  0x23   : > { %v209_v63 = vld [vmem:[%s1210_s19 + $0x1f0] sm:$0xff]  ;;  %v210_v1 = vld [vmem:[%s1210_s19 + $0x1f8] sm:$0xff] }
  0x25   : > { %1073 = vmatmul.mubr.msk.f32.gmra.mxu0 %vm213_vm0, %v158_v24  ;;  %1121 = vmatmul.mubr.msk.f32.gmra.mxu1 %vm213_vm0, %v190_v25 }
  0x26   : > { %1075 = vmatprep.mubr.msk.f32.mxu0 %vm213_vm0, %v159_v26  ;;  %1123 = vmatprep.mubr.msk.f32.mxu1 %vm213_vm0, %v191_v27 }
  0x29   : > { %1076 = vmatmul.mubr.msk.f32.gmra.mxu0 %vm213_vm0, %v160_v28  ;;  %1124 = vmatmul.mubr.msk.f32.gmra.mxu1 %vm213_vm0, %v192_v29 }
  0x2a   : > { %1078 = vmatprep.mubr.msk.f32.mxu0 %vm213_vm0, %v161_v30  ;;  %1126 = vmatprep.mubr.msk.f32.mxu1 %vm213_vm0, %v193_v31 }
  0x2d   : > { %1079 = vmatmul.mubr.msk.f32.gmra.mxu0 %vm213_vm0, %v162_v32  ;;  %1127 = vmatmul.mubr.msk.f32.gmra.mxu1 %vm213_vm0, %v194_v33 }
  0x2e   : > { %1081 = vmatprep.mubr.msk.f32.mxu0 %vm213_vm0, %v163_v34  ;;  %1129 = vmatprep.mubr.msk.f32.mxu1 %vm213_vm0, %v195_v35 }
  0x31   : > { %1082 = vmatmul.mubr.msk.f32.gmra.mxu0 %vm213_vm0, %v164_v36  ;;  %1130 = vmatmul.mubr.msk.f32.gmra.mxu1 %vm213_vm0, %v196_v37 }
  0x32   : > { %1084 = vmatprep.mubr.msk.f32.mxu0 %vm213_vm0, %v165_v38  ;;  %1132 = vmatprep.mubr.msk.f32.mxu1 %vm213_vm0, %v197_v39 }
  0x35   : > { %1085 = vmatmul.mubr.msk.f32.gmra.mxu0 %vm213_vm0, %v166_v40  ;;  %1133 = vmatmul.mubr.msk.f32.gmra.mxu1 %vm213_vm0, %v198_v41 }
  0x36   : > { %1087 = vmatprep.mubr.msk.f32.mxu0 %vm213_vm0, %v167_v42  ;;  %1135 = vmatprep.mubr.msk.f32.mxu1 %vm213_vm0, %v199_v43 }
  0x39   : > { %1088 = vmatmul.mubr.msk.f32.gmra.mxu0 %vm213_vm0, %v168_v44  ;;  %1136 = vmatmul.mubr.msk.f32.gmra.mxu1 %vm213_vm0, %v200_v45 }
  0x3a   : > { %1090 = vmatprep.mubr.msk.f32.mxu0 %vm213_vm0, %v169_v46  ;;  %1138 = vmatprep.mubr.msk.f32.mxu1 %vm213_vm0, %v201_v47 }
  0x3d   : > { %1091 = vmatmul.mubr.msk.f32.gmra.mxu0 %vm213_vm0, %v170_v48  ;;  %1139 = vmatmul.mubr.msk.f32.gmra.mxu1 %vm213_vm0, %v202_v49 }
  0x3e   : > { %1093 = vmatprep.mubr.msk.f32.mxu0 %vm213_vm0, %v171_v50  ;;  %1141 = vmatprep.mubr.msk.f32.mxu1 %vm213_vm0, %v203_v51 }
  0x41   : > { %1094 = vmatmul.mubr.msk.f32.gmra.mxu0 %vm213_vm0, %v172_v52  ;;  %1142 = vmatmul.mubr.msk.f32.gmra.mxu1 %vm213_vm0, %v204_v53 }
  0x42   : > { %1096 = vmatprep.mubr.msk.f32.mxu0 %vm213_vm0, %v173_v54  ;;  %1144 = vmatprep.mubr.msk.f32.mxu1 %vm213_vm0, %v205_v55 }
  0x45   : > { %1097 = vmatmul.mubr.msk.f32.gmra.mxu0 %vm213_vm0, %v174_v56  ;;  %1145 = vmatmul.mubr.msk.f32.gmra.mxu1 %vm213_vm0, %v206_v57 }
  0x46   : > { %1099 = vmatprep.mubr.msk.f32.mxu0 %vm213_vm0, %v175_v58  ;;  %1147 = vmatprep.mubr.msk.f32.mxu1 %vm213_vm0, %v207_v59 }
  0x49   : > { %1100 = vmatmul.mubr.msk.f32.gmra.mxu0 %vm213_vm0, %v176_v60  ;;  %1148 = vmatmul.mubr.msk.f32.gmra.mxu1 %vm213_vm0, %v208_v61 }
  0x4a   : > { %1102 = vmatprep.mubr.msk.f32.mxu0 %vm213_vm0, %v177_v62  ;;  %1150 = vmatprep.mubr.msk.f32.mxu1 %vm213_vm0, %v209_v63 }
  0x4d   : > { %1103 = vmatmul.mubr.msk.f32.gmra.mxu0 %vm213_vm0, %v178_v0  ;;  %1151 = vmatmul.mubr.msk.f32.gmra.mxu1 %vm213_vm0, %v210_v1 }
  0xd1   : > { %v1059_v2 = vpop.f32.mrf.mxu0  ;;  %v1107_v3 = vpop.f32.mrf.mxu1 }
  0xd2   : > { %793 = vst.msk [vmem:[%s1345_s22 + $0x8] sm:$0xff] %vm791_vm1, %v1059_v2  ;;  %825 = vst.msk [vmem:[%s1345_s22 + $0x108] sm:$0xff] %vm791_vm1, %v1107_v3 }
  0xd3   : > { %v472_v4 = vpop.f32.mrf.mxu0  ;;  %v632_v5 = vpop.f32.mrf.mxu1 }
  0xd4   : > { %792 = vst.msk [vmem:[%s1345_s22] sm:$0xff] %vm791_vm1, %v472_v4  ;;  %824 = vst.msk [vmem:[%s1345_s22 + $0x100] sm:$0xff] %vm791_vm1, %v632_v5 }
  0xd5   : > { %v1062_v6 = vpop.f32.mrf.mxu0  ;;  %v1110_v7 = vpop.f32.mrf.mxu1 }
  0xd6   : > { %795 = vst.msk [vmem:[%s1345_s22 + $0x18] sm:$0xff] %vm791_vm1, %v1062_v6  ;;  %827 = vst.msk [vmem:[%s1345_s22 + $0x118] sm:$0xff] %vm791_vm1, %v1110_v7 }
  0xd7   : > { %v482_v8 = vpop.f32.mrf.mxu0  ;;  %v642_v9 = vpop.f32.mrf.mxu1 }
  0xd8   : > { %794 = vst.msk [vmem:[%s1345_s22 + $0x10] sm:$0xff] %vm791_vm1, %v482_v8  ;;  %826 = vst.msk [vmem:[%s1345_s22 + $0x110] sm:$0xff] %vm791_vm1, %v642_v9 }
  0xd9   : > { %v1065_v10 = vpop.f32.mrf.mxu0  ;;  %v1113_v11 = vpop.f32.mrf.mxu1 }
  0xda   : > { %797 = vst.msk [vmem:[%s1345_s22 + $0x28] sm:$0xff] %vm791_vm1, %v1065_v10  ;;  %829 = vst.msk [vmem:[%s1345_s22 + $0x128] sm:$0xff] %vm791_vm1, %v1113_v11 }
  0xdb   : > { %v492_v12 = vpop.f32.mrf.mxu0  ;;  %v652_v13 = vpop.f32.mrf.mxu1 }
  0xdc   : > { %796 = vst.msk [vmem:[%s1345_s22 + $0x20] sm:$0xff] %vm791_vm1, %v492_v12  ;;  %828 = vst.msk [vmem:[%s1345_s22 + $0x120] sm:$0xff] %vm791_vm1, %v652_v13 }
  0xdd   : > { %v1068_v14 = vpop.f32.mrf.mxu0  ;;  %v1116_v15 = vpop.f32.mrf.mxu1 }
  0xde   : > { %799 = vst.msk [vmem:[%s1345_s22 + $0x38] sm:$0xff] %vm791_vm1, %v1068_v14  ;;  %831 = vst.msk [vmem:[%s1345_s22 + $0x138] sm:$0xff] %vm791_vm1, %v1116_v15 }
  0xdf   : > { %v502_v16 = vpop.f32.mrf.mxu0  ;;  %v662_v17 = vpop.f32.mrf.mxu1 }
  0xe0   : > { %798 = vst.msk [vmem:[%s1345_s22 + $0x30] sm:$0xff] %vm791_vm1, %v502_v16  ;;  %830 = vst.msk [vmem:[%s1345_s22 + $0x130] sm:$0xff] %vm791_vm1, %v662_v17 }
  0xe1   : > { %v1071_v18 = vpop.f32.mrf.mxu0  ;;  %v1119_v19 = vpop.f32.mrf.mxu1 }
  0xe2   : > { %801 = vst.msk [vmem:[%s1345_s22 + $0x48] sm:$0xff] %vm791_vm1, %v1071_v18  ;;  %833 = vst.msk [vmem:[%s1345_s22 + $0x148] sm:$0xff] %vm791_vm1, %v1119_v19 }
  0xe3   : > { %v512_v20 = vpop.f32.mrf.mxu0  ;;  %v672_v21 = vpop.f32.mrf.mxu1 }
  0xe4   : > { %800 = vst.msk [vmem:[%s1345_s22 + $0x40] sm:$0xff] %vm791_vm1, %v512_v20  ;;  %832 = vst.msk [vmem:[%s1345_s22 + $0x140] sm:$0xff] %vm791_vm1, %v672_v21 }
  0xe5   : > { %v1074_v22 = vpop.f32.mrf.mxu0  ;;  %v1122_v23 = vpop.f32.mrf.mxu1 }
  0xe6   : > { %803 = vst.msk [vmem:[%s1345_s22 + $0x58] sm:$0xff] %vm791_vm1, %v1074_v22  ;;  %835 = vst.msk [vmem:[%s1345_s22 + $0x158] sm:$0xff] %vm791_vm1, %v1122_v23 }
  0xe7   : > { %v522_v24 = vpop.f32.mrf.mxu0  ;;  %v682_v25 = vpop.f32.mrf.mxu1 }
  0xe8   : > { %802 = vst.msk [vmem:[%s1345_s22 + $0x50] sm:$0xff] %vm791_vm1, %v522_v24  ;;  %834 = vst.msk [vmem:[%s1345_s22 + $0x150] sm:$0xff] %vm791_vm1, %v682_v25 }
  0xe9   : > { %v1077_v26 = vpop.f32.mrf.mxu0  ;;  %v1125_v27 = vpop.f32.mrf.mxu1 }
  0xea   : > { %805 = vst.msk [vmem:[%s1345_s22 + $0x68] sm:$0xff] %vm791_vm1, %v1077_v26  ;;  %837 = vst.msk [vmem:[%s1345_s22 + $0x168] sm:$0xff] %vm791_vm1, %v1125_v27 }
  0xeb   : > { %v532_v28 = vpop.f32.mrf.mxu0  ;;  %v692_v29 = vpop.f32.mrf.mxu1 }
  0xec   : > { %804 = vst.msk [vmem:[%s1345_s22 + $0x60] sm:$0xff] %vm791_vm1, %v532_v28  ;;  %836 = vst.msk [vmem:[%s1345_s22 + $0x160] sm:$0xff] %vm791_vm1, %v692_v29 }
  0xed   : > { %v1080_v30 = vpop.f32.mrf.mxu0  ;;  %v1128_v31 = vpop.f32.mrf.mxu1 }
  0xee   : > { %807 = vst.msk [vmem:[%s1345_s22 + $0x78] sm:$0xff] %vm791_vm1, %v1080_v30  ;;  %839 = vst.msk [vmem:[%s1345_s22 + $0x178] sm:$0xff] %vm791_vm1, %v1128_v31 }
  0xef   : > { %v542_v32 = vpop.f32.mrf.mxu0  ;;  %v702_v33 = vpop.f32.mrf.mxu1 }
  0xf0   : > { %806 = vst.msk [vmem:[%s1345_s22 + $0x70] sm:$0xff] %vm791_vm1, %v542_v32  ;;  %838 = vst.msk [vmem:[%s1345_s22 + $0x170] sm:$0xff] %vm791_vm1, %v702_v33 }
  0xf1   : > { %v1083_v34 = vpop.f32.mrf.mxu0  ;;  %v1131_v35 = vpop.f32.mrf.mxu1 }
  0xf2   : > { %809 = vst.msk [vmem:[%s1345_s22 + $0x88] sm:$0xff] %vm791_vm1, %v1083_v34  ;;  %841 = vst.msk [vmem:[%s1345_s22 + $0x188] sm:$0xff] %vm791_vm1, %v1131_v35 }
  0xf3   : > { %v552_v36 = vpop.f32.mrf.mxu0  ;;  %v712_v37 = vpop.f32.mrf.mxu1 }
  0xf4   : > { %808 = vst.msk [vmem:[%s1345_s22 + $0x80] sm:$0xff] %vm791_vm1, %v552_v36  ;;  %840 = vst.msk [vmem:[%s1345_s22 + $0x180] sm:$0xff] %vm791_vm1, %v712_v37 }
  0xf5   : > { %v1086_v38 = vpop.f32.mrf.mxu0  ;;  %v1134_v39 = vpop.f32.mrf.mxu1 }
  0xf6   : > { %811 = vst.msk [vmem:[%s1345_s22 + $0x98] sm:$0xff] %vm791_vm1, %v1086_v38  ;;  %843 = vst.msk [vmem:[%s1345_s22 + $0x198] sm:$0xff] %vm791_vm1, %v1134_v39 }
  0xf7   : > { %v562_v40 = vpop.f32.mrf.mxu0  ;;  %v722_v41 = vpop.f32.mrf.mxu1 }
  0xf8   : > { %810 = vst.msk [vmem:[%s1345_s22 + $0x90] sm:$0xff] %vm791_vm1, %v562_v40  ;;  %842 = vst.msk [vmem:[%s1345_s22 + $0x190] sm:$0xff] %vm791_vm1, %v722_v41 }
  0xf9   : > { %v1089_v42 = vpop.f32.mrf.mxu0  ;;  %v1137_v43 = vpop.f32.mrf.mxu1 }
  0xfa   : > { %813 = vst.msk [vmem:[%s1345_s22 + $0xa8] sm:$0xff] %vm791_vm1, %v1089_v42  ;;  %845 = vst.msk [vmem:[%s1345_s22 + $0x1a8] sm:$0xff] %vm791_vm1, %v1137_v43 }
  0xfb   : > { %v572_v44 = vpop.f32.mrf.mxu0  ;;  %v732_v45 = vpop.f32.mrf.mxu1 }
  0xfc   : > { %812 = vst.msk [vmem:[%s1345_s22 + $0xa0] sm:$0xff] %vm791_vm1, %v572_v44  ;;  %844 = vst.msk [vmem:[%s1345_s22 + $0x1a0] sm:$0xff] %vm791_vm1, %v732_v45 }
  0xfd   : > { %v1092_v46 = vpop.f32.mrf.mxu0  ;;  %v1140_v47 = vpop.f32.mrf.mxu1 }
  0xfe   : > { %815 = vst.msk [vmem:[%s1345_s22 + $0xb8] sm:$0xff] %vm791_vm1, %v1092_v46  ;;  %847 = vst.msk [vmem:[%s1345_s22 + $0x1b8] sm:$0xff] %vm791_vm1, %v1140_v47 }
  0xff   : > { %v582_v48 = vpop.f32.mrf.mxu0  ;;  %v742_v49 = vpop.f32.mrf.mxu1 }
 0x100   : > { %814 = vst.msk [vmem:[%s1345_s22 + $0xb0] sm:$0xff] %vm791_vm1, %v582_v48  ;;  %846 = vst.msk [vmem:[%s1345_s22 + $0x1b0] sm:$0xff] %vm791_vm1, %v742_v49 }
 0x101   : > { %v1095_v50 = vpop.f32.mrf.mxu0  ;;  %v1143_v51 = vpop.f32.mrf.mxu1 }
 0x102   : > { %817 = vst.msk [vmem:[%s1345_s22 + $0xc8] sm:$0xff] %vm791_vm1, %v1095_v50  ;;  %849 = vst.msk [vmem:[%s1345_s22 + $0x1c8] sm:$0xff] %vm791_vm1, %v1143_v51 }
 0x103   : > { %v592_v52 = vpop.f32.mrf.mxu0  ;;  %v752_v53 = vpop.f32.mrf.mxu1 }
 0x104   : > { %816 = vst.msk [vmem:[%s1345_s22 + $0xc0] sm:$0xff] %vm791_vm1, %v592_v52  ;;  %848 = vst.msk [vmem:[%s1345_s22 + $0x1c0] sm:$0xff] %vm791_vm1, %v752_v53 }
 0x105   : > { %v1098_v54 = vpop.f32.mrf.mxu0  ;;  %v1146_v55 = vpop.f32.mrf.mxu1 }
 0x106   : > { %819 = vst.msk [vmem:[%s1345_s22 + $0xd8] sm:$0xff] %vm791_vm1, %v1098_v54  ;;  %851 = vst.msk [vmem:[%s1345_s22 + $0x1d8] sm:$0xff] %vm791_vm1, %v1146_v55 }
 0x107   : > { %v602_v56 = vpop.f32.mrf.mxu0  ;;  %v762_v57 = vpop.f32.mrf.mxu1 }
 0x108   : > { %818 = vst.msk [vmem:[%s1345_s22 + $0xd0] sm:$0xff] %vm791_vm1, %v602_v56  ;;  %850 = vst.msk [vmem:[%s1345_s22 + $0x1d0] sm:$0xff] %vm791_vm1, %v762_v57 }
 0x109   : > { %v1101_v58 = vpop.f32.mrf.mxu0  ;;  %v1149_v59 = vpop.f32.mrf.mxu1 }
 0x10a   : > { %821 = vst.msk [vmem:[%s1345_s22 + $0xe8] sm:$0xff] %vm791_vm1, %v1101_v58  ;;  %853 = vst.msk [vmem:[%s1345_s22 + $0x1e8] sm:$0xff] %vm791_vm1, %v1149_v59 }
 0x10b   : > { %v612_v60 = vpop.f32.mrf.mxu0  ;;  %v772_v61 = vpop.f32.mrf.mxu1 }
 0x10c   : > { %820 = vst.msk [vmem:[%s1345_s22 + $0xe0] sm:$0xff] %vm791_vm1, %v612_v60  ;;  %852 = vst.msk [vmem:[%s1345_s22 + $0x1e0] sm:$0xff] %vm791_vm1, %v772_v61 }
 0x10d   : > { %v1104_v62 = vpop.f32.mrf.mxu0  ;;  %v1152_v63 = vpop.f32.mrf.mxu1 }
 0x10e   : > { %823 = vst.msk [vmem:[%s1345_s22 + $0xf8] sm:$0xff] %vm791_vm1, %v1104_v62  ;;  %855 = vst.msk [vmem:[%s1345_s22 + $0x1f8] sm:$0xff] %vm791_vm1, %v1152_v63 }
 0x10f   : > { %v622_v0 = vpop.f32.mrf.mxu0  ;;  %v782_v1 = vpop.f32.mrf.mxu1 }
 0x110   : > { %822 = vst.msk [vmem:[%s1345_s22 + $0xf0] sm:$0xff] %vm791_vm1, %v622_v0  ;;  %854 = vst.msk [vmem:[%s1345_s22 + $0x1f0] sm:$0xff] %vm791_vm1, %v782_v1 }
 0x111 PF: > { %s12_s9 = sadd.s32 1, %s1171_s9  }
 0x112   : > { %p9_p4 = scmp.ge.s32.totalorder %s12_s9, 6  }
 0x114   :  { %11 = sbr.rel (!%p9_p4) target bundleno = 1 (0x1), region = 58 }

</bundles_post_ra>
